<compile_context>
chip_gen: v6e
topology: v6e:2x2x1
jax: 0.10.0
libtpu: 0.0.40
codegen_flags: <defaults>
</compile_context>

<pallas_src>
import math

import jax
import jax.numpy as jnp
from jax.experimental import pallas as pl
from jax.experimental.pallas import tpu as pltpu

_H1 = 128                 # first hidden width of the mu head (fixed by the module)
_H2 = 64                  # second hidden width of the mu head (unpadded)
_H2P = 128                # second hidden width padded to a full lane block
_E2 = math.exp(2.0)       # exp(LOG_STD_MAX)


def _round_up(x, m):
    return ((x + m - 1) // m) * m


def _make_actor_kernel(half_pad):
    """Kernel for mu/std packed into one (bb, 2*half_pad) lane-dense slab."""

    def kernel(x_ref, w1s_ref, b1s_ref, w2_ref, b2_ref, w3_ref, b3_ref, out_ref):
        # x arrives in its native dtype (f32); cast to bf16 in-kernel for the MXU.
        x = x_ref[...].astype(jnp.bfloat16)

        # Fused first layer: lanes [0,128) feed the mu head's first Linear,
        # lanes [128, 128+half_pad) are the std head's pre-activation.
        h = jnp.dot(x, w1s_ref[...], preferred_element_type=jnp.float32) + b1s_ref[...]
        h1 = jnp.maximum(h[:, :_H1], 0.0)             # ReLU, f32
        s = h[:, _H1:]                                # std-head pre-activation, f32

        h2 = jnp.dot(h1.astype(jnp.bfloat16), w2_ref[...],
                     preferred_element_type=jnp.float32) + b2_ref[...]
        h2 = jnp.maximum(h2, 0.0)                     # (bb, 128) lane-dense

        mu = jnp.tanh(jnp.dot(h2.astype(jnp.bfloat16), w3_ref[...],
                              preferred_element_type=jnp.float32) + b3_ref[...])

        # exp(clip(softplus(s), -20, 2)) == min(1 + exp(min(s, 2)), e^2)
        # (softplus >= 0 so the -20 bound is dead; min(s,2) avoids exp overflow).
        std = jnp.minimum(1.0 + jnp.exp(jnp.minimum(s, 2.0)), _E2)

        # One full-width, unmasked store: mu in lanes [0, half_pad),
        # std in lanes [half_pad, 2*half_pad).
        out_ref[...] = jnp.concatenate([mu, std], axis=-1).astype(out_ref.dtype)

    return kernel


def pack_params(params, n_actions):
    """Pack / pad the (in_features, out_features)-layout parameters for the kernel."""
    (w1, b1, w2, b2, w3, b3, ws, bs) = params
    half_pad = _round_up(max(n_actions, 1), 64)       # mu / std each get half_pad lanes

    # std head padded to half_pad output lanes.
    ws_p = jnp.zeros((ws.shape[0], half_pad), jnp.float32).at[:, :n_actions].set(ws)
    bs_p = jnp.zeros((1, half_pad), jnp.float32).at[:, :n_actions].set(bs)

    # W2 padded 64 -> 128 output lanes, W3 padded 64 -> 128 input rows and
    # half_pad output lanes (zero padding => identical math).
    w2_p = jnp.zeros((_H1, _H2P), jnp.float32).at[:, :_H2].set(w2)
    b2_p = jnp.zeros((1, _H2P), jnp.float32).at[:, :_H2].set(b2)
    w3_p = jnp.zeros((_H2P, half_pad), jnp.float32).at[:_H2, :n_actions].set(w3)
    b3_p = jnp.zeros((1, half_pad), jnp.float32).at[:, :n_actions].set(b3)

    w1s = jnp.concatenate([w1, ws_p], axis=1).astype(jnp.bfloat16)   # (state_dim, 128+half_pad)
    b1s = jnp.concatenate([b1, bs_p], axis=1)                        # (1, 128+half_pad) f32

    return dict(
        w1s=w1s, b1s=b1s,
        w2=w2_p.astype(jnp.bfloat16), b2=b2_p,
        w3=w3_p.astype(jnp.bfloat16), b3=b3_p,
        half_pad=half_pad, n_actions=n_actions,
    )


def actor_forward(x, packed, block_batch=4096, out_dtype=jnp.float32):
    half_pad = packed["half_pad"]
    n_actions = packed["n_actions"]
    batch, state_dim = x.shape
    k_fused = _H1 + half_pad          # fused first-layer output width
    out_w = 2 * half_pad              # packed mu|std slab width (multiple of 128)

    # VMEM-aware cap on the batch tile: double-buffered (x tile + out tile)
    # kept under ~10 MiB so even v5e's 16 MiB scoped default has slack for
    # intermediates.
    per_row_bytes = 2 * (out_w * jnp.dtype(out_dtype).itemsize + state_dim * x.dtype.itemsize)
    bb_cap = max(8, ((10 * 1024 * 1024) // max(per_row_bytes, 1)) // 8 * 8)

    if batch <= 128:
        # Tiny batch: one full-dim tile (dispatch latency dominates anyway).
        bb = batch
        padded_batch = batch
    else:
        # At least 2 tiles so both v7x TensorCores get work; tile rows multiple of 8.
        bb = min(block_batch, bb_cap, _round_up((batch + 1) // 2, 8))
        padded_batch = _round_up(batch, bb)

    x_p = x
    if padded_batch != batch:
        x_p = jnp.pad(x, ((0, padded_batch - batch), (0, 0)))

    grid = (padded_batch // bb,)
    const = lambda i: (0, 0)          # weights/biases: fetched once, VMEM-resident

    out = pl.pallas_call(
        _make_actor_kernel(half_pad),
        out_shape=jax.ShapeDtypeStruct((padded_batch, out_w), out_dtype),
        grid=grid,
        in_specs=[
            pl.BlockSpec((bb, state_dim), lambda i: (i, 0)),   # x: streamed per tile (f32)
            pl.BlockSpec((state_dim, k_fused), const),         # W1 || Ws (bf16)
            pl.BlockSpec((1, k_fused), const),                 # b1 || bs (f32)
            pl.BlockSpec((_H1, _H2P), const),                  # W2 padded (bf16)
            pl.BlockSpec((1, _H2P), const),                    # b2 padded (f32)
            pl.BlockSpec((_H2P, half_pad), const),             # W3 padded (bf16)
            pl.BlockSpec((1, half_pad), const),                # b3 padded (f32)
        ],
        out_specs=pl.BlockSpec((bb, out_w), lambda i: (i, 0)),
        compiler_params=pltpu.CompilerParams(
            dimension_semantics=("parallel",),   # shard batch tiles across TCs (v7x)
            vmem_limit_bytes=32 * 1024 * 1024,   # <= physical VMEM on v5e/v6e/v7x
        ),
    )(x_p, packed["w1s"], packed["b1s"], packed["w2"], packed["b2"],
      packed["w3"], packed["b3"])

    # NOTE: for large batches prefer consuming the packed slab directly (or
    # slicing inside the caller's jit) so these slices fuse into the consumer
    # instead of re-reading the slab from HBM.
    mu = out[:batch, :n_actions]
    std = out[:batch, half_pad:half_pad + n_actions]
    return mu, std


def init_params(key, state_dim, n_actions):
    """Deterministic init mimicking PyTorch's default uniform(-1/sqrt(fan_in), ...)."""
    def linear(key, fan_in, fan_out):
        kw, kb = jax.random.split(key)
        bound = 1.0 / jnp.sqrt(fan_in)
        w = jax.random.uniform(kw, (fan_in, fan_out), jnp.float32, -bound, bound)
        b = jax.random.uniform(kb, (1, fan_out), jnp.float32, -bound, bound)
        return w, b

    k1, k2, k3, k4 = jax.random.split(key, 4)
    w1, b1 = linear(k1, state_dim, 128)
    w2, b2 = linear(k2, 128, 64)
    w3, b3 = linear(k3, 64, n_actions)
    ws, bs = linear(k4, state_dim, n_actions)
    return (w1, b1, w2, b2, w3, b3, ws, bs)


def actor_forward_ref(x, params):
    """Pure-f32 reference with the exact PyTorch op sequence."""
    (w1, b1, w2, b2, w3, b3, ws, bs) = params
    h = jnp.maximum(x @ w1 + b1, 0.0)
    h = jnp.maximum(h @ w2 + b2, 0.0)
    mu = jnp.tanh(h @ w3 + b3)
    s = x @ ws + bs
    sp = jnp.maximum(s, 0.0) + jnp.log1p(jnp.exp(-jnp.abs(s)))     # softplus
    std = jnp.exp(jnp.clip(sp, -20.0, 2.0))
    return mu, std


def actor_forward_ref_packed(x, packed):
    """Reference mirroring the kernel's bf16-operand / fused-matmul / padded math."""
    half_pad = packed["half_pad"]
    n_actions = packed["n_actions"]
    xb = x.astype(jnp.bfloat16)
    h = jnp.dot(xb, packed["w1s"], preferred_element_type=jnp.float32) + packed["b1s"]
    h1 = jnp.maximum(h[:, :_H1], 0.0)
    s = h[:, _H1:]
    h2 = jnp.maximum(jnp.dot(h1.astype(jnp.bfloat16), packed["w2"],
                             preferred_element_type=jnp.float32) + packed["b2"], 0.0)
    mu = jnp.tanh(jnp.dot(h2.astype(jnp.bfloat16), packed["w3"],
                          preferred_element_type=jnp.float32) + packed["b3"])
    std = jnp.minimum(1.0 + jnp.exp(jnp.minimum(s, 2.0)), _E2)
    return mu[:, :n_actions], std[:, :n_actions]


# TODO(synk): get_dist/get_action (torch.distributions Normal rsample/log_prob) are
# host-side sampling utilities, not part of the module's forward; not implemented here.


if __name__ == "__main__":
    key = jax.random.PRNGKey(0)
    k_params, k_x1, k_x2 = jax.random.split(key, 3)

    state_dim = 16
    n_actions = 4

    params = init_params(k_params, state_dim, n_actions)
    packed = pack_params(params, n_actions)

    # Case 1: tiny batch -> single full-dim tile, no padding.
    x_small = jax.random.normal(k_x1, (4, state_dim), jnp.float32)
    mu_s, std_s = actor_forward(x_small, packed)
    jax.block_until_ready((mu_s, std_s))

    # Case 2: batch > 128 -> >=2 parallel tiles (152-row tiles, padded to 304).
    x_big = jax.random.normal(k_x2, (300, state_dim), jnp.float32)
    mu_b, std_b = actor_forward(x_big, packed)
    jax.block_until_ready((mu_b, std_b))

    for x, mu, std in ((x_small, mu_s, std_s), (x_big, mu_b, std_b)):
        # Tight check vs a reference mirroring the kernel math (bf16 dots, padded weights).
        mu_e, std_e = actor_forward_ref_packed(x, packed)
        assert jnp.allclose(mu, mu_e, atol=1e-4, rtol=1e-4), "mu mismatch (exact ref)"
        assert jnp.allclose(std, std_e, atol=1e-4, rtol=1e-4), "std mismatch (exact ref)"
        # Loose semantic check vs the original f32 PyTorch-style reference
        # (bf16 MXU operands => ~1e-3-level deviations expected).
        mu_r, std_r = actor_forward_ref(x, params)
        assert jnp.allclose(mu, mu_r, atol=5e-2, rtol=5e-2), "mu mismatch (f32 ref)"
        assert jnp.allclose(std, std_r, atol=1e-1, rtol=5e-2), "std mismatch (f32 ref)"

    print("KERNEL_OK")
</pallas_src>

<mosaic_0001>
module attributes {stable_mosaic.version = 11 : i64} {
  func.func @kernel(%arg0: i32, %arg1: memref<4x16xf32, #tpu.memory_space<vmem>>, %arg2: memref<16x192xbf16, #tpu.memory_space<vmem>>, %arg3: memref<1x192xf32, #tpu.memory_space<vmem>>, %arg4: memref<128x128xbf16, #tpu.memory_space<vmem>>, %arg5: memref<1x128xf32, #tpu.memory_space<vmem>>, %arg6: memref<128x64xbf16, #tpu.memory_space<vmem>>, %arg7: memref<1x64xf32, #tpu.memory_space<vmem>>, %arg8: memref<4x128xf32, #tpu.memory_space<vmem>>) attributes {dimension_semantics = [#tpu.dimension_semantics<parallel>], iteration_bounds = array<i64: 1>, scalar_prefetch = 0 : i64, scratch_operands = 0 : i64, tpu.core_type = #tpu.core_type<tc>, window_params = [{transform_indices = @transform_0, window_bounds = array<i64: 4, 16>}, {pipeline_mode = #tpu.pipeline_mode<synchronous>, transform_indices = @transform_1, window_bounds = array<i64: 16, 192>}, {pipeline_mode = #tpu.pipeline_mode<synchronous>, transform_indices = @transform_2, window_bounds = array<i64: 1, 192>}, {pipeline_mode = #tpu.pipeline_mode<synchronous>, transform_indices = @transform_3, window_bounds = array<i64: 128, 128>}, {pipeline_mode = #tpu.pipeline_mode<synchronous>, transform_indices = @transform_4, window_bounds = array<i64: 1, 128>}, {pipeline_mode = #tpu.pipeline_mode<synchronous>, transform_indices = @transform_5, window_bounds = array<i64: 128, 64>}, {pipeline_mode = #tpu.pipeline_mode<synchronous>, transform_indices = @transform_6, window_bounds = array<i64: 1, 64>}, {transform_indices = @transform_7, window_bounds = array<i64: 4, 128>}]} {
    %c0 = arith.constant 0 : index
    %c0_0 = arith.constant 0 : index
    %0 = vector.load %arg1[%c0, %c0_0] : memref<4x16xf32, #tpu.memory_space<vmem>>, vector<4x16xf32>
    %1 = arith.truncf %0 : vector<4x16xf32> to vector<4x16xbf16>
    %c0_1 = arith.constant 0 : index
    %c0_2 = arith.constant 0 : index
    %2 = vector.load %arg2[%c0_1, %c0_2] : memref<16x192xbf16, #tpu.memory_space<vmem>>, vector<16x192xbf16>
    %cst = arith.constant dense<0.000000e+00> : vector<4x192xf32>
    %3 = tpu.matmul %1, %2, %cst {dimension_numbers = #tpu.dot_dimension_numbers<[1], [0], [0], [1], [0, 0, 1, 1], [], []>} : vector<4x16xbf16>, vector<16x192xbf16>, vector<4x192xf32> -> vector<4x192xf32>
    %c0_3 = arith.constant 0 : index
    %c0_4 = arith.constant 0 : index
    %4 = vector.load %arg3[%c0_3, %c0_4] : memref<1x192xf32, #tpu.memory_space<vmem>>, vector<1x192xf32>
    %5 = vector.broadcast %4 : vector<1x192xf32> to vector<4x192xf32>
    %6 = arith.addf %3, %5 : vector<4x192xf32>
    %7 = vector.extract_strided_slice %6 {offsets = [0, 0], sizes = [4, 128], strides = [1, 1]} : vector<4x192xf32> to vector<4x128xf32>
    %cst_5 = arith.constant 0.000000e+00 : f32
    %8 = vector.broadcast %cst_5 : f32 to vector<4x128xf32>
    %9 = arith.maximumf %7, %8 : vector<4x128xf32>
    %10 = vector.extract_strided_slice %6 {offsets = [0, 128], sizes = [4, 64], strides = [1, 1]} : vector<4x192xf32> to vector<4x64xf32>
    %11 = arith.truncf %9 : vector<4x128xf32> to vector<4x128xbf16>
    %c0_6 = arith.constant 0 : index
    %c0_7 = arith.constant 0 : index
    %12 = vector.load %arg4[%c0_6, %c0_7] : memref<128x128xbf16, #tpu.memory_space<vmem>>, vector<128x128xbf16>
    %cst_8 = arith.constant dense<0.000000e+00> : vector<4x128xf32>
    %13 = tpu.matmul %11, %12, %cst_8 {dimension_numbers = #tpu.dot_dimension_numbers<[1], [0], [0], [1], [0, 0, 1, 1], [], []>} : vector<4x128xbf16>, vector<128x128xbf16>, vector<4x128xf32> -> vector<4x128xf32>
    %c0_9 = arith.constant 0 : index
    %c0_10 = arith.constant 0 : index
    %14 = vector.load %arg5[%c0_9, %c0_10] : memref<1x128xf32, #tpu.memory_space<vmem>>, vector<1x128xf32>
    %15 = vector.broadcast %14 : vector<1x128xf32> to vector<4x128xf32>
    %16 = arith.addf %13, %15 : vector<4x128xf32>
    %cst_11 = arith.constant 0.000000e+00 : f32
    %17 = vector.broadcast %cst_11 : f32 to vector<4x128xf32>
    %18 = arith.maximumf %16, %17 : vector<4x128xf32>
    %19 = arith.truncf %18 : vector<4x128xf32> to vector<4x128xbf16>
    %c0_12 = arith.constant 0 : index
    %c0_13 = arith.constant 0 : index
    %20 = vector.load %arg6[%c0_12, %c0_13] : memref<128x64xbf16, #tpu.memory_space<vmem>>, vector<128x64xbf16>
    %cst_14 = arith.constant dense<0.000000e+00> : vector<4x64xf32>
    %21 = tpu.matmul %19, %20, %cst_14 {dimension_numbers = #tpu.dot_dimension_numbers<[1], [0], [0], [1], [0, 0, 1, 1], [], []>} : vector<4x128xbf16>, vector<128x64xbf16>, vector<4x64xf32> -> vector<4x64xf32>
    %c0_15 = arith.constant 0 : index
    %c0_16 = arith.constant 0 : index
    %22 = vector.load %arg7[%c0_15, %c0_16] : memref<1x64xf32, #tpu.memory_space<vmem>>, vector<1x64xf32>
    %23 = vector.broadcast %22 : vector<1x64xf32> to vector<4x64xf32>
    %24 = arith.addf %21, %23 : vector<4x64xf32>
    %25 = math.tanh %24 : vector<4x64xf32>
    %cst_17 = arith.constant 2.000000e+00 : f32
    %26 = vector.broadcast %cst_17 : f32 to vector<4x64xf32>
    %27 = arith.minimumf %10, %26 : vector<4x64xf32>
    %28 = math.exp %27 : vector<4x64xf32>
    %cst_18 = arith.constant 1.000000e+00 : f32
    %29 = vector.broadcast %cst_18 : f32 to vector<4x64xf32>
    %30 = arith.addf %29, %28 : vector<4x64xf32>
    %cst_19 = arith.constant 7.3890562 : f32
    %31 = vector.broadcast %cst_19 : f32 to vector<4x64xf32>
    %32 = arith.minimumf %30, %31 : vector<4x64xf32>
    %33 = tpu.concatenate %25, %32 in 1 : vector<4x64xf32>, vector<4x64xf32> -> vector<4x128xf32>
    %c0_20 = arith.constant 0 : index
    %c0_21 = arith.constant 0 : index
    %34 = vector.load %arg8[%c0_20, %c0_21] : memref<4x128xf32, #tpu.memory_space<vmem>>, vector<4x128xf32>
    tpu.vector_store %arg8[%c0_20, %c0_21], %33 {strides = array<i32>} : memref<4x128xf32, #tpu.memory_space<vmem>>, vector<4x128xf32>,
    return
  }
  func.func @transform_0(%arg0: i32) -> (i32, i32) {
    %c0_i32 = arith.constant 0 : i32
    %c0_i32_0 = arith.constant 0 : i32
    return %arg0, %c0_i32 : i32, i32
  }
  func.func @transform_1(%arg0: i32) -> (i32, i32) {
    %c0_i32 = arith.constant 0 : i32
    %c0_i32_0 = arith.constant 0 : i32
    %c0_i32_1 = arith.constant 0 : i32
    return %c0_i32, %c0_i32_0 : i32, i32
  }
  func.func @transform_2(%arg0: i32) -> (i32, i32) {
    %c0_i32 = arith.constant 0 : i32
    %c0_i32_0 = arith.constant 0 : i32
    %c0_i32_1 = arith.constant 0 : i32
    return %c0_i32, %c0_i32_0 : i32, i32
  }
  func.func @transform_3(%arg0: i32) -> (i32, i32) {
    %c0_i32 = arith.constant 0 : i32
    %c0_i32_0 = arith.constant 0 : i32
    %c0_i32_1 = arith.constant 0 : i32
    return %c0_i32, %c0_i32_0 : i32, i32
  }
  func.func @transform_4(%arg0: i32) -> (i32, i32) {
    %c0_i32 = arith.constant 0 : i32
    %c0_i32_0 = arith.constant 0 : i32
    %c0_i32_1 = arith.constant 0 : i32
    return %c0_i32, %c0_i32_0 : i32, i32
  }
  func.func @transform_5(%arg0: i32) -> (i32, i32) {
    %c0_i32 = arith.constant 0 : i32
    %c0_i32_0 = arith.constant 0 : i32
    %c0_i32_1 = arith.constant 0 : i32
    return %c0_i32, %c0_i32_0 : i32, i32
  }
  func.func @transform_6(%arg0: i32) -> (i32, i32) {
    %c0_i32 = arith.constant 0 : i32
    %c0_i32_0 = arith.constant 0 : i32
    %c0_i32_1 = arith.constant 0 : i32
    return %c0_i32, %c0_i32_0 : i32, i32
  }
  func.func @transform_7(%arg0: i32) -> (i32, i32) {
    %c0_i32 = arith.constant 0 : i32
    %c0_i32_0 = arith.constant 0 : i32
    return %arg0, %c0_i32 : i32, i32
  }
}

</mosaic_0001>

<bundles_post_ra>
// kernel: tpu_custom_call.1
= control target key start
LH: loop header
LB: loop body
LE: loop exit
PB: predicated region body
PF: predicated region fallthrough
CT: control target
= control target key end

     0   :  { %v481_v2 = vmov 0   ;;  %v482_v6 = vmov 0.0   ;;  %vm54_vm0 = vcmask 130048   ;;  %s613_s0 = inlined_call_operand.vmem [shape: f32[4,16], index: 0, kind: input, shape index: {}]   ;;  %s614_s1 = inlined_call_operand.vmem [shape: bf16[16,192], index: 1, kind: input, shape index: {}]   ;;  %s615_s2 = inlined_call_operand.vmem [shape: f32[1,192], index: 2, kind: input, shape index: {}]   ;;  %s616_s3 = inlined_call_operand.vmem [shape: bf16[128,128], index: 3, kind: input, shape index: {}]   ;;  %s617_s4 = inlined_call_operand.vmem [shape: f32[1,128], index: 4, kind: input, shape index: {}]   ;;  %s618_s5 = inlined_call_operand.vmem [shape: bf16[128,64], index: 5, kind: input, shape index: {}]   ;;  %s619_s6 = inlined_call_operand.vmem [shape: f32[1,64], index: 6, kind: input, shape index: {}]   ;;  %s620_s7 = inlined_call_operand.hbm [shape: f32[4,128], index: 7, kind: output, shape index: {}]  }
   0x1   :  { %v436_v0 = vld [vmem:[%s614_s1 + $0x4] ss:$8 sps:$4 sm:$0xff]   ;;  %v438_v1 = vld [vmem:[%s614_s1] ss:$8 sps:$4 sm:$0xff]   ;;  %90 = vmatprep.mubr.bf16.mxu0 %v481_v2  ;;  %v439_v4 = vld [vmem:[%s616_s3 + $0x38] sm:$0xff]   ;;  %391 = vmatprep.subr.bf16.mxu1 %v482_v6 }
   0x2   :  { %v28_v3 = vld [vmem:[%s613_s0] sm:$0xf]  ;;  %72 = vmatprep.subr.bf16.mxu0 %v436_v0  ;;  %392 = vmatpush3.bf16.msra.mxu1 %v439_v4  ;;  %v440_v7 = vld [vmem:[%s616_s3 + $0x30] sm:$0xff]   ;;  %v441_v8 = vld [vmem:[%s616_s3 + $0x28] sm:$0xff]  }
   0x3   :  { %v29_v5 = vpack.c.bf16 %v28_v3, %v28_v3  ;;  %73 = vmatpush1.bf16.msra.mxu0 %v438_v1  ;;  %393 = vmatprep.subr.bf16.mxu1 %v482_v6  ;;  %v442_v9 = vld [vmem:[%s616_s3 + $0x20] sm:$0xff]  }
   0x4   :  { %411 = vmatprep.subr.bf16.mxu0 %v482_v6 }
   0x6   :  { %354 = vmatmul.mubr.msk.bf16.vlgmr.msra.gmra.mxu0 %vm54_vm0, %v29_v5  ;;  %394 = vmatpush3.bf16.msra.mxu1 %v440_v7 }
   0x7   :  { %395 = vmatprep.subr.bf16.mxu1 %v482_v6 }
   0xa   :  { %396 = vmatpush3.bf16.msra.mxu1 %v441_v8 }
   0xb   :  { %397 = vmatprep.subr.bf16.mxu1 %v482_v6 }
   0xc   :  { %12 = vsyncpa [#allocation3], 0  ;;  %v443_v10 = vld [vmem:[%s616_s3 + $0x18] sm:$0xff]   ;;  %v444_v11 = vld [vmem:[%s616_s3 + $0x10] sm:$0xff]   ;;  %vm483_vm1 = vmmov 0   ;;  %v34_v14 = vlaneseq  ;;  %s484_s29 = smov 64  }
   0xd   :  { %v445_v12 = vld [vmem:[%s616_s3 + $0x8] sm:$0xff]   ;;  %v446_v13 = vld [vmem:[%s616_s3] sm:$0xff]   ;;  %407 = vmatprep.mubr.msk.bf16.mxu1 %vm483_vm1, %v482_v6  ;;  %427 = vmatprep.mubr.msk.bf16.mxu0 %vm483_vm1, %v482_v6  ;;  %v447_v31 = vld [vmem:[%s618_s5 + $0x38] sm:$0xff]   ;;  %vm335_vm2 = vcmask 523264  }
   0xe   :  { %398 = vmatpush3.bf16.msra.mxu1 %v442_v9  ;;  %v35_v15 = vshrl.u32 %v34_v14, 7  ;;  %v32_v17 = vld [vmem:[%s615_s2] sm:$0x3]  ;;  %412 = vmatpush3.bf16.msra.mxu0 %v447_v31  ;;  %v448_v32 = vld [vmem:[%s618_s5 + $0x30] sm:$0xff]   ;;  %v449_v33 = vld [vmem:[%s618_s5 + $0x28] sm:$0xff]  }
   0xf   :  { %399 = vmatprep.subr.bf16.mxu1 %v482_v6  ;;  %413 = vmatprep.subr.bf16.mxu0 %v482_v6  ;;  %v450_v36 = vld [vmem:[%s618_s5 + $0x20] sm:$0xff]   ;;  %v451_v38 = vld [vmem:[%s618_s5 + $0x18] sm:$0xff]   ;;  %v452_v39 = vld [vmem:[%s618_s5 + $0x10] sm:$0xff]  }
  0x10   :  { %v36_v16 = vsub.s32 0, %v35_v15  ;;  %v40_v18 = vsub.s32 1, %v35_v15  ;;  %v453_v40 = vld [vmem:[%s618_s5 + $0x8] sm:$0xff]   ;;  %v454_v41 = vld [vmem:[%s618_s5] sm:$0xff]   ;;  %s485_s5 = smov [#allocation2]  }
  0x11   :  { %v355_v42 = vld [vmem:[%s617_s4] ss:$0 sm:$0xff]  ;;  %s344_s4 = sshll.u32 %s485_s5, 4  ;;  %s345_s4 = int_to_ptr.vmem [resolvable:$true] %s344_s4 }
  0x12   :  { %400 = vmatpush3.bf16.msra.mxu1 %v443_v10  ;;  %v37_v19 = vrot.slane %v32_v17, %v36_v16  ;;  %v41_v20 = vrot.slane %v32_v17, %v40_v18  ;;  %414 = vmatpush3.bf16.msra.mxu0 %v448_v32  ;;  %v364_v50 = vld [vmem:[%s619_s6] ss:$0 sm:$0xff]  ;;  %s459_s17 = scalar_lea.vmem %s345_s4, 64  ;;  %p464_p1 = scmp.lt.s32.totalorder %s345_s4, %s345_s4 }
  0x13   :  { %401 = vmatprep.subr.bf16.mxu1 %v482_v6  ;;  %415 = vmatprep.subr.bf16.mxu0 %v482_v6  ;;  %p460_p0 = scmp.ne.s32.totalorder %s345_s4, %s459_s17  ;;  %p465_p2 = scmp.lt.s32.totalorder %s459_s17, %s459_s17 }
  0x15   :  { %p466_p3 = por %p465_p2, %p464_p1 }
  0x16   :  { %402 = vmatpush3.bf16.msra.mxu1 %v444_v11  ;;  %416 = vmatpush3.bf16.msra.mxu0 %v449_v33 }
  0x17   :  { %403 = vmatprep.subr.bf16.mxu1 %v482_v6  ;;  %417 = vmatprep.subr.bf16.mxu0 %v482_v6  ;;  %p467_p4 = pnand %p466_p3, %p460_p0 }
  0x1a   :  { %404 = vmatpush3.bf16.msra.mxu1 %v445_v12  ;;  %418 = vmatpush3.bf16.msra.mxu0 %v450_v36 }
  0x1b   :  { %405 = vmatprep.subr.bf16.mxu1 %v482_v6  ;;  %419 = vmatprep.subr.bf16.mxu0 %v482_v6 }
  0x1e   :  { %406 = vmatpush3.bf16.msra.mxu1 %v446_v13  ;;  %420 = vmatpush3.bf16.msra.mxu0 %v451_v38 }
  0x1f   :  { %421 = vmatprep.subr.bf16.mxu0 %v482_v6 }
  0x22   :  { %422 = vmatpush3.bf16.msra.mxu0 %v452_v39 }
  0x23   :  { %423 = vmatprep.subr.bf16.mxu0 %v482_v6 }
  0x26   :  { %424 = vmatpush3.bf16.msra.mxu0 %v453_v40 }
  0x27   :  { %425 = vmatprep.subr.bf16.mxu0 %v482_v6 }
  0x2a   :  { %426 = vmatpush3.bf16.msra.mxu0 %v454_v41 }
  0xc6   :  { %v92_v21 = vpop.f32.mrf.mxu0 }
  0xc7   :  { %v93_v22 = vadd.f32 %v92_v21, %v37_v19 }
  0xc8   :  { %v94_v23 = vpop.f32.mrf.mxu0 }
  0xc9   :  { %v99_v24 = vmax.f32 %v93_v22, 0.0  ;;  %v95_v25 = vadd.f32 %v94_v23, %v41_v20 }
  0xca   :  { %v96_v26 = vpop.f32.mrf.mxu0 }
  0xcb   :  { %v100_v27 = vpack.c.bf16 %v99_v24, %v99_v24  ;;  %v326_v28 = vmin.f32 %v95_v25, 2.0 }
  0xcc   :  { %v97_v29 = vpop.f32.mrf.mxu0 }
  0xcd   :  { %v327_v30 = vmul.f32 1.442695, %v326_v28  ;;  %408 = vmatmul.mubr.bf16.vlgmr.msra.gmra.mxu1 %v100_v27 }
  0xcf   :  { %455 = vpow2.f32 %v327_v30 }
  0xdc   :  { %v456_v34 = vpop.eup %455 }
  0xdd   :  { %v329_v35 = vadd.f32 1.0, %v456_v34 }
  0xdf   :  { %v330_v37 = vmin.f32 %v329_v35, 7.389056 }
  0xe1   :  { %332 = vrot.lane.b32.xlu0 %v330_v37, %s484_s29 }
 0x153   :  { %v333_v57 = vpop.permute.xlu0 %332 }
 0x18d   :  { %v206_v43 = vpop.f32.mrf.mxu1 }
 0x18e   :  { %v207_v44 = vadd.f32 %v355_v42, %v206_v43 }
 0x18f   :  { %v409_v45 = vpop.f32.mrf.mxu1 }
 0x190   :  { %v212_v46 = vmax.f32 %v207_v44, 0.0 }
 0x191   :  { %v209_v47 = vpop.f32.mrf.mxu1 }
 0x192   :  { %v213_v48 = vpack.c.bf16 %v212_v46, %v212_v46 }
 0x193   :  { %v410_v49 = vpop.f32.mrf.mxu1 }
 0x194   :  { %428 = vmatmul.mubr.bf16.vlgmr.msra.gmra.mxu0 %v213_v48 }
 0x254   :  { %v319_v51 = vpop.f32.mrf.mxu0 }
 0x255   :  { %v320_v52 = vadd.f32 %v364_v50, %v319_v51 }
 0x256   :  { %v429_v53 = vpop.f32.mrf.mxu0 }
 0x257   :  { %457 = vtanh.f32 %v320_v52 }
 0x258   :  { %v322_v54 = vpop.f32.mrf.mxu0 }
 0x25a   :  { %v430_v55 = vpop.f32.mrf.mxu0 }
 0x264   :  { %v458_v56 = vpop.eup %457 }
 0x265   :  { %v336_v58 = vsel %vm335_vm2, %v458_v56, %v333_v57 }
 0x266   :  { %337 = vst [vmem:[#allocation2] sm:$0xf] %v336_v58 }
 0x267   :  { %470 = shalt.err (!%p467_p4)
}
 0x268   :  { %347 = dma.vmem_to_hbm [thread:$0]  %s345_s4, 64, %s620_s7, [#allocation3]  }
 0x269   :  { %479 = dma.done.wait [#allocation3], 64  }
 0x26a   :  { %480 = vsyncadd [#allocation3], 4294967232 }
 0x26b   :  { %351 = vsyncpa [#allocation3], 1 }

</bundles_post_ra>
